<compile_context>
chip_gen: v5e
topology: v5e:2x2
jax: 0.10.0
libtpu: 0.0.40
codegen_flags: <defaults>
</compile_context>

<pallas_src>
import jax
import jax.numpy as jnp
from jax.experimental import pallas as pl
from jax.experimental.pallas import tpu as pltpu


# ------------------------------------------------------------------
# Tiny-N fast path: whole matmul in one kernel invocation (no grid).
# ------------------------------------------------------------------
def _matmul_single_kernel(a_ref, b_ref, o_ref):
    o_ref[...] = jnp.dot(
        a_ref[...], b_ref[...], preferred_element_type=jnp.float32
    ).astype(o_ref.dtype)


def _matmul_small(a: jax.Array, b: jax.Array) -> jax.Array:
    N = a.shape[0]
    bytes_accessed = 3 * N * N * a.dtype.itemsize
    return pl.pallas_call(
        _matmul_single_kernel,
        out_shape=jax.ShapeDtypeStruct((N, N), a.dtype),
        in_specs=[
            pl.BlockSpec((N, N), lambda: (0, 0)),
            pl.BlockSpec((N, N), lambda: (0, 0)),
        ],
        out_specs=pl.BlockSpec((N, N), lambda: (0, 0)),
        cost_estimate=pl.CostEstimate(
            flops=2 * N * N * N, transcendentals=0, bytes_accessed=bytes_accessed
        ),
        compiler_params=pltpu.CompilerParams(vmem_limit_bytes=48 * 1024 * 1024),
    )(a, b)


# ------------------------------------------------------------------
# Tiled path: accumulate directly into the resident f32 output tile.
# ------------------------------------------------------------------
def _matmul_tiled_kernel(a_ref, b_ref, o_ref):
    # The output block index (i, j) is constant across the K grid axis, so the
    # tile stays resident in VMEM: zero it on the first K step, accumulate into it.
    @pl.when(pl.program_id(2) == 0)
    def _():
        o_ref[...] = jnp.zeros_like(o_ref)

    o_ref[...] += jnp.dot(
        a_ref[...], b_ref[...], preferred_element_type=jnp.float32
    )


def _choose_tiling(n: int):
    """Pick (padded_N, tile) for the tiled path.

    Tiles are multiples of 128 up to 1024, capped at ~N/2 so the parallel grid
    axes have at least 2 blocks (keeps both v7x TensorCores busy and gives the
    pipeline something to overlap).  Among candidates we minimize padded work,
    tie-breaking toward the larger tile (fewer grid steps, less HBM re-streaming).
    """
    cap = min(1024, max(256, (n // 2) // 128 * 128))
    candidates = [t for t in (1024, 896, 768, 640, 512, 384, 256) if t <= cap]
    best = None
    for t in candidates:
        padded = -(-n // t) * t  # ceil(n / t) * t
        key = (padded, -t)
        if best is None or key < best[:2]:
            best = (padded, -t, t)
    return best[0], best[2]


def _matmul_tiled(a: jax.Array, b: jax.Array) -> jax.Array:
    N = a.shape[0]
    P, tile = _choose_tiling(N)
    tm = tn = tk = tile

    # Zero-pad to the tile multiple if necessary (zeros contribute nothing to
    # the K reduction, and we slice the result back to (N, N)).
    if P != N:
        pad = P - N
        a = jnp.pad(a, ((0, pad), (0, pad)))
        b = jnp.pad(b, ((0, pad), (0, pad)))

    itemsize = a.dtype.itemsize
    gm, gn, gk = P // tm, P // tn, P // tk

    # Double-buffered A/B input tiles + double-buffered output tile (accumulator
    # lives in the output block itself -> no extra scratch).
    working_set = 2 * (tm * tk + tk * tn + tm * tn) * itemsize
    # v7x-safe (64 MiB physical): working set tops out at ~24 MiB for 1024 tiles.
    vmem_limit = min(max(32 * 1024 * 1024, working_set + 16 * 1024 * 1024),
                     56 * 1024 * 1024)

    # Actual HBM traffic: A is streamed once per j block, B once per i block,
    # C written once.
    bytes_accessed = (P * P * gn + P * P * gm + P * P) * itemsize

    out = pl.pallas_call(
        _matmul_tiled_kernel,
        out_shape=jax.ShapeDtypeStruct((P, P), a.dtype),
        grid_spec=pltpu.PrefetchScalarGridSpec(
            num_scalar_prefetch=0,
            grid=(gm, gn, gk),
            in_specs=[
                pl.BlockSpec((tm, tk), lambda i, j, k: (i, k)),
                pl.BlockSpec((tk, tn), lambda i, j, k: (k, j)),
            ],
            out_specs=pl.BlockSpec((tm, tn), lambda i, j, k: (i, j)),
        ),
        cost_estimate=pl.CostEstimate(
            flops=2 * P * P * P, transcendentals=0, bytes_accessed=bytes_accessed
        ),
        compiler_params=pltpu.CompilerParams(
            dimension_semantics=("parallel", "parallel", "arbitrary"),
            vmem_limit_bytes=vmem_limit,
        ),
    )(a, b)

    if P != N:
        out = out[:N, :N]
    return out


def matmul(a: jax.Array, b: jax.Array) -> jax.Array:
    """C = A @ B for square (N, N) matrices (f32), matching the reference module."""
    N, K = a.shape
    K2, M = b.shape
    assert N == K == K2 == M, "reference kernel is for square matrices"
    a = a.astype(jnp.float32)
    b = b.astype(jnp.float32)

    # Tiny problems: single no-grid call (DMA serialization is negligible here).
    if N < 512:
        return _matmul_small(a, b)
    # Everything else goes through the pipelined tiled path.
    return _matmul_tiled(a, b)


if __name__ == "__main__":
    key = jax.random.PRNGKey(0)

    # Primary small example (no-grid fast path).
    N = 256
    ka, kb = jax.random.split(key)
    A = jax.random.normal(ka, (N, N), dtype=jnp.float32)
    B = jax.random.normal(kb, (N, N), dtype=jnp.float32)
    C = matmul(A, B)
    jax.block_until_ready(C)
    assert jnp.allclose(C, A @ B, atol=1e-3, rtol=1e-3), "small-path mismatch"

    # Tiled path with padding (N=640 -> padded to 768, tile 256, grid 3x3x3).
    N2 = 640
    ka2, kb2 = jax.random.split(jax.random.PRNGKey(1))
    A2 = jax.random.normal(ka2, (N2, N2), dtype=jnp.float32)
    B2 = jax.random.normal(kb2, (N2, N2), dtype=jnp.float32)
    C2 = matmul(A2, B2)
    jax.block_until_ready(C2)
    assert jnp.allclose(C2, A2 @ B2, atol=1e-2, rtol=1e-3), "padded tiled mismatch"

    # Tiled path, exact fit (N=1024 -> tile 512, grid 2x2x2).
    N3 = 1024
    ka3, kb3 = jax.random.split(jax.random.PRNGKey(2))
    A3 = jax.random.normal(ka3, (N3, N3), dtype=jnp.float32)
    B3 = jax.random.normal(kb3, (N3, N3), dtype=jnp.float32)
    C3 = matmul(A3, B3)
    jax.block_until_ready(C3)
    assert jnp.allclose(C3, A3 @ B3, atol=1e-2, rtol=1e-3), "tiled mismatch"

    print("KERNEL_OK")
</pallas_src>

<mosaic_0001>
module attributes {stable_mosaic.version = 11 : i64} {
  func.func @_matmul_single_kernel(%arg0: memref<256x256xf32, #tpu.memory_space<vmem>>, %arg1: memref<256x256xf32, #tpu.memory_space<vmem>>, %arg2: memref<256x256xf32, #tpu.memory_space<vmem>>) attributes {dimension_semantics = [], scalar_prefetch = 0 : i64, scratch_operands = 0 : i64, tpu.core_type = #tpu.core_type<tc>} {
    %c0 = arith.constant 0 : index
    %c0_0 = arith.constant 0 : index
    %0 = vector.load %arg0[%c0, %c0_0] : memref<256x256xf32, #tpu.memory_space<vmem>>, vector<256x256xf32>
    %c0_1 = arith.constant 0 : index
    %c0_2 = arith.constant 0 : index
    %1 = vector.load %arg1[%c0_1, %c0_2] : memref<256x256xf32, #tpu.memory_space<vmem>>, vector<256x256xf32>
    %cst = arith.constant dense<0.000000e+00> : vector<256x256xf32>
    %2 = tpu.matmul %0, %1, %cst {dimension_numbers = #tpu.dot_dimension_numbers<[1], [0], [0], [1], [0, 0, 1, 1], [], []>} : vector<256x256xf32>, vector<256x256xf32>, vector<256x256xf32> -> vector<256x256xf32>
    %c0_3 = arith.constant 0 : index
    %c0_4 = arith.constant 0 : index
    %3 = vector.load %arg2[%c0_3, %c0_4] : memref<256x256xf32, #tpu.memory_space<vmem>>, vector<256x256xf32>
    tpu.vector_store %arg2[%c0_3, %c0_4], %2 {strides = array<i32>} : memref<256x256xf32, #tpu.memory_space<vmem>>, vector<256x256xf32>,
    return
  }
}

</mosaic_0001>

<bundles_post_ra>
// kernel: tpu_custom_call.1
= control target key start
LH: loop header
LB: loop body
LE: loop exit
PB: predicated region body
PF: predicated region fallthrough
CT: control target
= control target key end

     0   :  { %7 = vsyncpa [#allocation3], 0  ;;  %s829_s0 = inlined_call_operand.hbm [shape: f32[256,256], index: 0, kind: input, shape index: {}]   ;;  %s830_s1 = inlined_call_operand.hbm [shape: f32[256,256], index: 1, kind: input, shape index: {}]   ;;  %s831_s2 = inlined_call_operand.hbm [shape: f32[256,256], index: 2, kind: output, shape index: {}]  }
   0x1   :  { %8 = vsyncpa [#allocation6], 0 }
   0x2   :  { %9 = vsyncpa [#allocation4], 0  ;;  %s14_s11 = sshll.u32 %s829_s0, 4  ;;  %s791_s12 = smov [#allocation2]   ;;  %s15_s11 = int_to_ptr.hbm [resolvable:$true] %s14_s11 }
   0x3   :  { %s16_s13 = sshll.u32 %s791_s12, 4  ;;  %s27_s16 = sshll.u32 %s830_s1, 4  ;;  %s17_s13 = int_to_ptr.vmem [resolvable:$true] %s16_s13  ;;  %s28_s16 = int_to_ptr.hbm [resolvable:$true] %s27_s16 }
   0x4   :  { %s792_s17 = smov 256   ;;  %s793_s18 = smov 16  }
   0x5   :  { %22 = dma.hbm_to_vmem [thread:$0]  %s15_s11, 8192, %s17_s13, [#allocation3], %s792_s17, %s792_s17, %s793_s18  }
   0x6   :  { %s794_s19 = smov [#allocation5]  }
   0x7   :  { %s29_s20 = sshll.u32 %s794_s19, 4  ;;  %s30_s20 = int_to_ptr.vmem [resolvable:$true] %s29_s20 }
   0x8   :  { %35 = dma.hbm_to_vmem [thread:$0]  %s28_s16, 8192, %s30_s20, [#allocation6], %s792_s17, %s792_s17, %s793_s18  }
   0x9   :  { %785 = dma.done.wait [#allocation3], 8192  }
   0xa   :  { %786 = vsyncadd [#allocation3], 4294959104 }
   0xb   :  { %787 = dma.done.wait [#allocation6], 8192  }
   0xc   :  { %788 = vsyncadd [#allocation6], 4294959104  ;;  %v139_v0 = vld [vmem:[#allocation5 + $0xf8] sm:$0xff]  ;;  %v137_v2 = vld [vmem:[#allocation5 + $0xe8] sm:$0xff]  ;;  %s795_s0 = smov [#allocation7]   ;;  %s694_s23 = sshll.u32 %s831_s2, 4  ;;  %s695_s23 = int_to_ptr.hbm [resolvable:$true] %s694_s23 }
   0xd   :  { %v171_v1 = vld [vmem:[#allocation5 + $0x1f8] sm:$0xff]  ;;  %398 = vmatpush.msra.mxu2 %v139_v0  ;;  %v169_v3 = vld [vmem:[#allocation5 + $0x1e8] sm:$0xff]  ;;  %v138_v6 = vld [vmem:[#allocation5 + $0xf0] sm:$0xff]  ;;  %s692_s1 = sshll.u32 %s795_s0, 4  ;;  %s693_s1 = int_to_ptr.vmem [resolvable:$true] %s692_s1 }
   0xe   :  { %511 = vmatpush.msra.mxu3 %v171_v1  ;;  %v135_v4 = vld [vmem:[#allocation5 + $0xd8] sm:$0xff]  ;;  %v170_v7 = vld [vmem:[#allocation5 + $0x1f0] sm:$0xff]  ;;  %v136_v8 = vld [vmem:[#allocation5 + $0xe0] sm:$0xff]  ;;  %172 = vmatpush.msra.mxu0 %v138_v6 }
   0xf   :  { %v167_v5 = vld [vmem:[#allocation5 + $0x1d8] sm:$0xff]  ;;  %399 = vmatpush.msra.mxu2 %v137_v2  ;;  %v168_v9 = vld [vmem:[#allocation5 + $0x1e0] sm:$0xff]  ;;  %285 = vmatpush.msra.mxu1 %v170_v7  ;;  %v133_v10 = vld [vmem:[#allocation5 + $0xc8] sm:$0xff] }
  0x10   :  { %512 = vmatpush.msra.mxu3 %v169_v3  ;;  %v165_v11 = vld [vmem:[#allocation5 + $0x1c8] sm:$0xff]  ;;  %v134_v12 = vld [vmem:[#allocation5 + $0xd0] sm:$0xff]  ;;  %173 = vmatpush.msra.mxu0 %v136_v8  ;;  %v131_v14 = vld [vmem:[#allocation5 + $0xb8] sm:$0xff] }
  0x11   :  { %400 = vmatpush.msra.mxu2 %v135_v4  ;;  %v166_v13 = vld [vmem:[#allocation5 + $0x1d0] sm:$0xff]  ;;  %286 = vmatpush.msra.mxu1 %v168_v9  ;;  %v163_v15 = vld [vmem:[#allocation5 + $0x1b8] sm:$0xff]  ;;  %v132_v16 = vld [vmem:[#allocation5 + $0xc0] sm:$0xff] }
  0x12   :  { %513 = vmatpush.msra.mxu3 %v167_v5  ;;  %v164_v17 = vld [vmem:[#allocation5 + $0x1c0] sm:$0xff]  ;;  %174 = vmatpush.msra.mxu0 %v134_v12  ;;  %v129_v18 = vld [vmem:[#allocation5 + $0xa8] sm:$0xff]  ;;  %v130_v20 = vld [vmem:[#allocation5 + $0xb0] sm:$0xff] }
  0x13   :  { %401 = vmatpush.msra.mxu2 %v133_v10  ;;  %287 = vmatpush.msra.mxu1 %v166_v13  ;;  %v161_v19 = vld [vmem:[#allocation5 + $0x1a8] sm:$0xff]  ;;  %v162_v21 = vld [vmem:[#allocation5 + $0x1b0] sm:$0xff]  ;;  %v127_v22 = vld [vmem:[#allocation5 + $0x98] sm:$0xff] }
  0x14   :  { %514 = vmatpush.msra.mxu3 %v165_v11  ;;  %175 = vmatpush.msra.mxu0 %v132_v16  ;;  %v159_v23 = vld [vmem:[#allocation5 + $0x198] sm:$0xff]  ;;  %v128_v24 = vld [vmem:[#allocation5 + $0xa0] sm:$0xff]  ;;  %v125_v26 = vld [vmem:[#allocation5 + $0x88] sm:$0xff] }
  0x15   :  { %402 = vmatpush.msra.mxu2 %v131_v14  ;;  %288 = vmatpush.msra.mxu1 %v164_v17  ;;  %v160_v25 = vld [vmem:[#allocation5 + $0x1a0] sm:$0xff]  ;;  %v157_v27 = vld [vmem:[#allocation5 + $0x188] sm:$0xff]  ;;  %v126_v28 = vld [vmem:[#allocation5 + $0x90] sm:$0xff] }
  0x16   :  { %515 = vmatpush.msra.mxu3 %v163_v15  ;;  %176 = vmatpush.msra.mxu0 %v130_v20  ;;  %v158_v29 = vld [vmem:[#allocation5 + $0x190] sm:$0xff]  ;;  %v123_v30 = vld [vmem:[#allocation5 + $0x78] sm:$0xff]  ;;  %v124_v32 = vld [vmem:[#allocation5 + $0x80] sm:$0xff] }
  0x17   :  { %403 = vmatpush.msra.mxu2 %v129_v18  ;;  %289 = vmatpush.msra.mxu1 %v162_v21  ;;  %v155_v31 = vld [vmem:[#allocation5 + $0x178] sm:$0xff]  ;;  %v156_v33 = vld [vmem:[#allocation5 + $0x180] sm:$0xff]  ;;  %v121_v34 = vld [vmem:[#allocation5 + $0x68] sm:$0xff] }
  0x18   :  { %516 = vmatpush.msra.mxu3 %v161_v19  ;;  %177 = vmatpush.msra.mxu0 %v128_v24  ;;  %v153_v35 = vld [vmem:[#allocation5 + $0x168] sm:$0xff]  ;;  %v122_v36 = vld [vmem:[#allocation5 + $0x70] sm:$0xff]  ;;  %v119_v38 = vld [vmem:[#allocation5 + $0x58] sm:$0xff] }
  0x19   :  { %404 = vmatpush.msra.mxu2 %v127_v22  ;;  %290 = vmatpush.msra.mxu1 %v160_v25  ;;  %v154_v37 = vld [vmem:[#allocation5 + $0x170] sm:$0xff]  ;;  %v151_v39 = vld [vmem:[#allocation5 + $0x158] sm:$0xff]  ;;  %v120_v40 = vld [vmem:[#allocation5 + $0x60] sm:$0xff] }
  0x1a   :  { %517 = vmatpush.msra.mxu3 %v159_v23  ;;  %178 = vmatpush.msra.mxu0 %v126_v28  ;;  %v152_v41 = vld [vmem:[#allocation5 + $0x160] sm:$0xff]  ;;  %v117_v42 = vld [vmem:[#allocation5 + $0x48] sm:$0xff]  ;;  %v118_v44 = vld [vmem:[#allocation5 + $0x50] sm:$0xff] }
  0x1b   :  { %405 = vmatpush.msra.mxu2 %v125_v26  ;;  %291 = vmatpush.msra.mxu1 %v158_v29  ;;  %v149_v43 = vld [vmem:[#allocation5 + $0x148] sm:$0xff]  ;;  %v150_v45 = vld [vmem:[#allocation5 + $0x150] sm:$0xff]  ;;  %v115_v46 = vld [vmem:[#allocation5 + $0x38] sm:$0xff] }
  0x1c   :  { %518 = vmatpush.msra.mxu3 %v157_v27  ;;  %179 = vmatpush.msra.mxu0 %v124_v32  ;;  %v147_v47 = vld [vmem:[#allocation5 + $0x138] sm:$0xff]  ;;  %v116_v48 = vld [vmem:[#allocation5 + $0x40] sm:$0xff]  ;;  %v113_v50 = vld [vmem:[#allocation5 + $0x28] sm:$0xff] }
  0x1d   :  { %406 = vmatpush.msra.mxu2 %v123_v30  ;;  %292 = vmatpush.msra.mxu1 %v156_v33  ;;  %v148_v49 = vld [vmem:[#allocation5 + $0x140] sm:$0xff]  ;;  %v145_v51 = vld [vmem:[#allocation5 + $0x128] sm:$0xff]  ;;  %v114_v52 = vld [vmem:[#allocation5 + $0x30] sm:$0xff] }
  0x1e   :  { %519 = vmatpush.msra.mxu3 %v155_v31  ;;  %180 = vmatpush.msra.mxu0 %v122_v36  ;;  %v146_v53 = vld [vmem:[#allocation5 + $0x130] sm:$0xff]  ;;  %v111_v54 = vld [vmem:[#allocation5 + $0x18] sm:$0xff]  ;;  %v112_v56 = vld [vmem:[#allocation5 + $0x20] sm:$0xff] }
  0x1f   :  { %407 = vmatpush.msra.mxu2 %v121_v34  ;;  %293 = vmatpush.msra.mxu1 %v154_v37  ;;  %v143_v55 = vld [vmem:[#allocation5 + $0x118] sm:$0xff]  ;;  %v144_v57 = vld [vmem:[#allocation5 + $0x120] sm:$0xff]  ;;  %v109_v58 = vld [vmem:[#allocation5 + $0x8] sm:$0xff] }
  0x20   :  { %520 = vmatpush.msra.mxu3 %v153_v35  ;;  %181 = vmatpush.msra.mxu0 %v120_v40  ;;  %v141_v59 = vld [vmem:[#allocation5 + $0x108] sm:$0xff]  ;;  %v44_v60 = vld [vmem:[#allocation2] sm:$0xff]  ;;  %v110_v62 = vld [vmem:[#allocation5 + $0x10] sm:$0xff] }
  0x21   :  { %408 = vmatpush.msra.mxu2 %v119_v38  ;;  %294 = vmatpush.msra.mxu1 %v152_v41  ;;  %v45_v61 = vld [vmem:[#allocation2 + $0x8] sm:$0xff]  ;;  %v142_v63 = vld [vmem:[#allocation5 + $0x110] sm:$0xff]  ;;  %v108_v0 = vld [vmem:[#allocation5] sm:$0xff] }
  0x22   :  { %521 = vmatpush.msra.mxu3 %v151_v39  ;;  %182 = vmatpush.msra.mxu0 %v118_v44  ;;  %v140_v1 = vld [vmem:[#allocation5 + $0x100] sm:$0xff]  ;;  %v46_v2 = vld [vmem:[#allocation2 + $0x10] sm:$0xff]  ;;  %v47_v3 = vld [vmem:[#allocation2 + $0x18] sm:$0xff] }
  0x23   :  { %409 = vmatpush.msra.mxu2 %v117_v42  ;;  %295 = vmatpush.msra.mxu1 %v150_v45  ;;  %v48_v4 = vld [vmem:[#allocation2 + $0x20] sm:$0xff]  ;;  %v49_v5 = vld [vmem:[#allocation2 + $0x28] sm:$0xff]  ;;  %v50_v6 = vld [vmem:[#allocation2 + $0x30] sm:$0xff] }
  0x24   :  { %522 = vmatpush.msra.mxu3 %v149_v43  ;;  %183 = vmatpush.msra.mxu0 %v116_v48  ;;  %v51_v7 = vld [vmem:[#allocation2 + $0x38] sm:$0xff]  ;;  %v52_v8 = vld [vmem:[#allocation2 + $0x40] sm:$0xff]  ;;  %v53_v9 = vld [vmem:[#allocation2 + $0x48] sm:$0xff] }
  0x25   :  { %410 = vmatpush.msra.mxu2 %v115_v46  ;;  %296 = vmatpush.msra.mxu1 %v148_v49  ;;  %v54_v10 = vld [vmem:[#allocation2 + $0x50] sm:$0xff]  ;;  %v55_v11 = vld [vmem:[#allocation2 + $0x58] sm:$0xff]  ;;  %v56_v12 = vld [vmem:[#allocation2 + $0x60] sm:$0xff] }
  0x26   :  { %523 = vmatpush.msra.mxu3 %v147_v47  ;;  %184 = vmatpush.msra.mxu0 %v114_v52  ;;  %v57_v13 = vld [vmem:[#allocation2 + $0x68] sm:$0xff]  ;;  %v58_v14 = vld [vmem:[#allocation2 + $0x70] sm:$0xff]  ;;  %v59_v15 = vld [vmem:[#allocation2 + $0x78] sm:$0xff] }
  0x27   :  { %411 = vmatpush.msra.mxu2 %v113_v50  ;;  %297 = vmatpush.msra.mxu1 %v146_v53  ;;  %v60_v16 = vld [vmem:[#allocation2 + $0x80] sm:$0xff]  ;;  %v61_v17 = vld [vmem:[#allocation2 + $0x88] sm:$0xff]  ;;  %v62_v18 = vld [vmem:[#allocation2 + $0x90] sm:$0xff] }
  0x28   :  { %524 = vmatpush.msra.mxu3 %v145_v51  ;;  %185 = vmatpush.msra.mxu0 %v112_v56  ;;  %v63_v19 = vld [vmem:[#allocation2 + $0x98] sm:$0xff]  ;;  %v64_v20 = vld [vmem:[#allocation2 + $0xa0] sm:$0xff]  ;;  %v65_v21 = vld [vmem:[#allocation2 + $0xa8] sm:$0xff] }
  0x29   :  { %412 = vmatpush.msra.mxu2 %v111_v54  ;;  %298 = vmatpush.msra.mxu1 %v144_v57  ;;  %v66_v22 = vld [vmem:[#allocation2 + $0xb0] sm:$0xff]  ;;  %v67_v23 = vld [vmem:[#allocation2 + $0xb8] sm:$0xff]  ;;  %v68_v24 = vld [vmem:[#allocation2 + $0xc0] sm:$0xff] }
  0x2a   :  { %525 = vmatpush.msra.mxu3 %v143_v55  ;;  %186 = vmatpush.msra.mxu0 %v110_v62  ;;  %v69_v25 = vld [vmem:[#allocation2 + $0xc8] sm:$0xff]  ;;  %v70_v26 = vld [vmem:[#allocation2 + $0xd0] sm:$0xff]  ;;  %v71_v27 = vld [vmem:[#allocation2 + $0xd8] sm:$0xff] }
  0x2b   :  { %413 = vmatpush.msra.mxu2 %v109_v58  ;;  %299 = vmatpush.msra.mxu1 %v142_v63  ;;  %v72_v28 = vld [vmem:[#allocation2 + $0xe0] sm:$0xff]  ;;  %v73_v29 = vld [vmem:[#allocation2 + $0xe8] sm:$0xff]  ;;  %v74_v30 = vld [vmem:[#allocation2 + $0xf0] sm:$0xff] }
  0x2c   :  { %526 = vmatpush.msra.mxu3 %v141_v59  ;;  %414 = vmatmul.f32.vlgmr.msra.gmra.mxu2 %v44_v60  ;;  %v75_v31 = vld [vmem:[#allocation2 + $0xf8] sm:$0xff]  ;;  %v76_v32 = vld [vmem:[#allocation2 + $0x100] sm:$0xff]  ;;  %v77_v33 = vld [vmem:[#allocation2 + $0x108] sm:$0xff] }
  0x2d   :  { %527 = vmatmul.f32.vlgmr.msra.gmra.mxu3 %v45_v61  ;;  %187 = vmatpush.msra.mxu0 %v108_v0  ;;  %v78_v40 = vld [vmem:[#allocation2 + $0x110] sm:$0xff]  ;;  %v79_v41 = vld [vmem:[#allocation2 + $0x118] sm:$0xff]  ;;  %v80_v48 = vld [vmem:[#allocation2 + $0x120] sm:$0xff] }
  0x2e   :  { %300 = vmatpush.msra.mxu1 %v140_v1  ;;  %188 = vmatmul.f32.vlgmr.msra.gmra.mxu0 %v44_v60  ;;  %v81_v49 = vld [vmem:[#allocation2 + $0x128] sm:$0xff]  ;;  %v82_v56 = vld [vmem:[#allocation2 + $0x130] sm:$0xff]  ;;  %v83_v57 = vld [vmem:[#allocation2 + $0x138] sm:$0xff] }
  0x2f   :  { %301 = vmatmul.f32.vlgmr.msra.gmra.mxu1 %v45_v61  ;;  %v84_v0 = vld [vmem:[#allocation2 + $0x140] sm:$0xff]  ;;  %v85_v1 = vld [vmem:[#allocation2 + $0x148] sm:$0xff] }
  0x34   :  { %417 = vmatmul.f32.gmra.mxu2 %v46_v2 }
  0x35   :  { %530 = vmatmul.f32.gmra.mxu3 %v47_v3 }
  0x36   :  { %191 = vmatmul.f32.gmra.mxu0 %v46_v2 }
  0x37   :  { %304 = vmatmul.f32.gmra.mxu1 %v47_v3 }
  0x3c   :  { %420 = vmatmul.f32.gmra.mxu2 %v48_v4 }
  0x3d   :  { %533 = vmatmul.f32.gmra.mxu3 %v49_v5 }
  0x3e   :  { %194 = vmatmul.f32.gmra.mxu0 %v48_v4 }
  0x3f   :  { %307 = vmatmul.f32.gmra.mxu1 %v49_v5 }
  0x44   :  { %423 = vmatmul.f32.gmra.mxu2 %v50_v6 }
  0x45   :  { %536 = vmatmul.f32.gmra.mxu3 %v51_v7 }
  0x46   :  { %197 = vmatmul.f32.gmra.mxu0 %v50_v6 }
  0x47   :  { %310 = vmatmul.f32.gmra.mxu1 %v51_v7 }
  0x4c   :  { %426 = vmatmul.f32.gmra.mxu2 %v52_v8 }
  0x4d   :  { %539 = vmatmul.f32.gmra.mxu3 %v53_v9 }
  0x4e   :  { %200 = vmatmul.f32.gmra.mxu0 %v52_v8  ;;  %v86_v8 = vld [vmem:[#allocation2 + $0x150] sm:$0xff] }
  0x4f   :  { %313 = vmatmul.f32.gmra.mxu1 %v53_v9  ;;  %v87_v9 = vld [vmem:[#allocation2 + $0x158] sm:$0xff] }
  0x54   :  { %429 = vmatmul.f32.gmra.mxu2 %v54_v10 }
  0x55   :  { %542 = vmatmul.f32.gmra.mxu3 %v55_v11 }
  0x56   :  { %203 = vmatmul.f32.gmra.mxu0 %v54_v10 }
  0x57   :  { %316 = vmatmul.f32.gmra.mxu1 %v55_v11 }
  0x5c   :  { %432 = vmatmul.f32.gmra.mxu2 %v56_v12 }
  0x5d   :  { %545 = vmatmul.f32.gmra.mxu3 %v57_v13 }
  0x5e   :  { %206 = vmatmul.f32.gmra.mxu0 %v56_v12 }
  0x5f   :  { %319 = vmatmul.f32.gmra.mxu1 %v57_v13 }
  0x64   :  { %435 = vmatmul.f32.gmra.mxu2 %v58_v14 }
  0x65   :  { %548 = vmatmul.f32.gmra.mxu3 %v59_v15 }
  0x66   :  { %209 = vmatmul.f32.gmra.mxu0 %v58_v14 }
  0x67   :  { %322 = vmatmul.f32.gmra.mxu1 %v59_v15 }
  0x6c   :  { %438 = vmatmul.f32.gmra.mxu2 %v60_v16 }
  0x6d   :  { %551 = vmatmul.f32.gmra.mxu3 %v61_v17 }
  0x6e   :  { %212 = vmatmul.f32.gmra.mxu0 %v60_v16  ;;  %v88_v16 = vld [vmem:[#allocation2 + $0x160] sm:$0xff] }
  0x6f   :  { %325 = vmatmul.f32.gmra.mxu1 %v61_v17  ;;  %v89_v17 = vld [vmem:[#allocation2 + $0x168] sm:$0xff] }
  0x74   :  { %441 = vmatmul.f32.gmra.mxu2 %v62_v18 }
  0x75   :  { %554 = vmatmul.f32.gmra.mxu3 %v63_v19 }
  0x76   :  { %215 = vmatmul.f32.gmra.mxu0 %v62_v18 }
  0x77   :  { %328 = vmatmul.f32.gmra.mxu1 %v63_v19 }
  0x7c   :  { %444 = vmatmul.f32.gmra.mxu2 %v64_v20 }
  0x7d   :  { %557 = vmatmul.f32.gmra.mxu3 %v65_v21 }
  0x7e   :  { %218 = vmatmul.f32.gmra.mxu0 %v64_v20 }
  0x7f   :  { %331 = vmatmul.f32.gmra.mxu1 %v65_v21 }
  0x84   :  { %447 = vmatmul.f32.gmra.mxu2 %v66_v22 }
  0x85   :  { %560 = vmatmul.f32.gmra.mxu3 %v67_v23 }
  0x86   :  { %221 = vmatmul.f32.gmra.mxu0 %v66_v22 }
  0x87   :  { %334 = vmatmul.f32.gmra.mxu1 %v67_v23 }
  0x8c   :  { %450 = vmatmul.f32.gmra.mxu2 %v68_v24 }
  0x8d   :  { %563 = vmatmul.f32.gmra.mxu3 %v69_v25 }
  0x8e   :  { %224 = vmatmul.f32.gmra.mxu0 %v68_v24  ;;  %v90_v24 = vld [vmem:[#allocation2 + $0x170] sm:$0xff] }
  0x8f   :  { %337 = vmatmul.f32.gmra.mxu1 %v69_v25  ;;  %v91_v25 = vld [vmem:[#allocation2 + $0x178] sm:$0xff] }
  0x94   :  { %453 = vmatmul.f32.gmra.mxu2 %v70_v26 }
  0x95   :  { %566 = vmatmul.f32.gmra.mxu3 %v71_v27 }
  0x96   :  { %227 = vmatmul.f32.gmra.mxu0 %v70_v26 }
  0x97   :  { %340 = vmatmul.f32.gmra.mxu1 %v71_v27 }
  0x9c   :  { %456 = vmatmul.f32.gmra.mxu2 %v72_v28 }
  0x9d   :  { %569 = vmatmul.f32.gmra.mxu3 %v73_v29 }
  0x9e   :  { %230 = vmatmul.f32.gmra.mxu0 %v72_v28 }
  0x9f   :  { %343 = vmatmul.f32.gmra.mxu1 %v73_v29 }
  0xa4   :  { %459 = vmatmul.f32.gmra.mxu2 %v74_v30 }
  0xa5   :  { %572 = vmatmul.f32.gmra.mxu3 %v75_v31 }
  0xa6   :  { %233 = vmatmul.f32.gmra.mxu0 %v74_v30 }
  0xa7   :  { %346 = vmatmul.f32.gmra.mxu1 %v75_v31 }
  0xab   :  { %v189_v34 = vpop.f32.mrf.mxu0 }
  0xac   :  { %462 = vmatmul.f32.gmra.mxu2 %v76_v32  ;;  %v302_v35 = vpop.f32.mrf.mxu1 }
  0xad   :  { %575 = vmatmul.f32.gmra.mxu3 %v77_v33  ;;  %v303_v36 = vadd.f32 %v302_v35, %v189_v34 }
  0xae   :  { %236 = vmatmul.f32.gmra.mxu0 %v76_v32  ;;  %v92_v32 = vld [vmem:[#allocation2 + $0x180] sm:$0xff] }
  0xaf   :  { %v415_v37 = vpop.f32.mrf.mxu2  ;;  %624 = vst [vmem:[#allocation7] sm:$0xff] %v303_v36  ;;  %349 = vmatmul.f32.gmra.mxu1 %v77_v33  ;;  %v93_v33 = vld [vmem:[#allocation2 + $0x188] sm:$0xff] }
  0xb0   :  { %v528_v38 = vpop.f32.mrf.mxu3 }
  0xb1   :  { %v529_v39 = vadd.f32 %v528_v38, %v415_v37 }
  0xb3   :  { %625 = vst [vmem:[#allocation7 + $0x8] sm:$0xff] %v529_v39  ;;  %v192_v42 = vpop.f32.mrf.mxu0 }
  0xb4   :  { %465 = vmatmul.f32.gmra.mxu2 %v78_v40  ;;  %v305_v43 = vpop.f32.mrf.mxu1 }
  0xb5   :  { %578 = vmatmul.f32.gmra.mxu3 %v79_v41  ;;  %v306_v44 = vadd.f32 %v305_v43, %v192_v42 }
  0xb6   :  { %239 = vmatmul.f32.gmra.mxu0 %v78_v40  ;;  %v94_v40 = vld [vmem:[#allocation2 + $0x190] sm:$0xff] }
  0xb7   :  { %v418_v45 = vpop.f32.mrf.mxu2  ;;  %626 = vst [vmem:[#allocation7 + $0x10] sm:$0xff] %v306_v44  ;;  %352 = vmatmul.f32.gmra.mxu1 %v79_v41  ;;  %v95_v41 = vld [vmem:[#allocation2 + $0x198] sm:$0xff] }
  0xb8   :  { %v531_v46 = vpop.f32.mrf.mxu3 }
  0xb9   :  { %v532_v47 = vadd.f32 %v531_v46, %v418_v45 }
  0xbb   :  { %627 = vst [vmem:[#allocation7 + $0x18] sm:$0xff] %v532_v47  ;;  %v195_v50 = vpop.f32.mrf.mxu0 }
  0xbc   :  { %468 = vmatmul.f32.gmra.mxu2 %v80_v48  ;;  %v308_v51 = vpop.f32.mrf.mxu1 }
  0xbd   :  { %581 = vmatmul.f32.gmra.mxu3 %v81_v49  ;;  %v309_v52 = vadd.f32 %v308_v51, %v195_v50 }
  0xbe   :  { %242 = vmatmul.f32.gmra.mxu0 %v80_v48  ;;  %v96_v48 = vld [vmem:[#allocation2 + $0x1a0] sm:$0xff] }
  0xbf   :  { %v421_v53 = vpop.f32.mrf.mxu2  ;;  %628 = vst [vmem:[#allocation7 + $0x20] sm:$0xff] %v309_v52  ;;  %355 = vmatmul.f32.gmra.mxu1 %v81_v49  ;;  %v97_v49 = vld [vmem:[#allocation2 + $0x1a8] sm:$0xff] }
  0xc0   :  { %v534_v54 = vpop.f32.mrf.mxu3 }
  0xc1   :  { %v535_v55 = vadd.f32 %v534_v54, %v421_v53 }
  0xc3   :  { %629 = vst [vmem:[#allocation7 + $0x28] sm:$0xff] %v535_v55  ;;  %v198_v58 = vpop.f32.mrf.mxu0 }
  0xc4   :  { %471 = vmatmul.f32.gmra.mxu2 %v82_v56  ;;  %v311_v59 = vpop.f32.mrf.mxu1 }
  0xc5   :  { %584 = vmatmul.f32.gmra.mxu3 %v83_v57  ;;  %v312_v60 = vadd.f32 %v311_v59, %v198_v58 }
  0xc6   :  { %245 = vmatmul.f32.gmra.mxu0 %v82_v56  ;;  %v98_v56 = vld [vmem:[#allocation2 + $0x1b0] sm:$0xff] }
  0xc7   :  { %v424_v61 = vpop.f32.mrf.mxu2  ;;  %630 = vst [vmem:[#allocation7 + $0x30] sm:$0xff] %v312_v60  ;;  %358 = vmatmul.f32.gmra.mxu1 %v83_v57  ;;  %v99_v57 = vld [vmem:[#allocation2 + $0x1b8] sm:$0xff] }
  0xc8   :  { %v537_v62 = vpop.f32.mrf.mxu3 }
  0xc9   :  { %v538_v63 = vadd.f32 %v537_v62, %v424_v61 }
  0xcb   :  { %631 = vst [vmem:[#allocation7 + $0x38] sm:$0xff] %v538_v63  ;;  %v201_v2 = vpop.f32.mrf.mxu0 }
  0xcc   :  { %474 = vmatmul.f32.gmra.mxu2 %v84_v0  ;;  %v314_v3 = vpop.f32.mrf.mxu1 }
  0xcd   :  { %587 = vmatmul.f32.gmra.mxu3 %v85_v1  ;;  %v315_v4 = vadd.f32 %v314_v3, %v201_v2 }
  0xce   :  { %248 = vmatmul.f32.gmra.mxu0 %v84_v0  ;;  %v100_v0 = vld [vmem:[#allocation2 + $0x1c0] sm:$0xff] }
  0xcf   :  { %v427_v5 = vpop.f32.mrf.mxu2  ;;  %632 = vst [vmem:[#allocation7 + $0x40] sm:$0xff] %v315_v4  ;;  %361 = vmatmul.f32.gmra.mxu1 %v85_v1  ;;  %v101_v1 = vld [vmem:[#allocation2 + $0x1c8] sm:$0xff] }
  0xd0   :  { %v540_v6 = vpop.f32.mrf.mxu3 }
  0xd1   :  { %v541_v7 = vadd.f32 %v540_v6, %v427_v5 }
  0xd3   :  { %633 = vst [vmem:[#allocation7 + $0x48] sm:$0xff] %v541_v7  ;;  %v204_v10 = vpop.f32.mrf.mxu0 }
  0xd4   :  { %477 = vmatmul.f32.gmra.mxu2 %v86_v8  ;;  %v317_v11 = vpop.f32.mrf.mxu1 }
  0xd5   :  { %590 = vmatmul.f32.gmra.mxu3 %v87_v9  ;;  %v318_v12 = vadd.f32 %v317_v11, %v204_v10 }
  0xd6   :  { %251 = vmatmul.f32.gmra.mxu0 %v86_v8  ;;  %v102_v8 = vld [vmem:[#allocation2 + $0x1d0] sm:$0xff] }
  0xd7   :  { %v430_v13 = vpop.f32.mrf.mxu2  ;;  %634 = vst [vmem:[#allocation7 + $0x50] sm:$0xff] %v318_v12  ;;  %364 = vmatmul.f32.gmra.mxu1 %v87_v9  ;;  %v103_v9 = vld [vmem:[#allocation2 + $0x1d8] sm:$0xff] }
  0xd8   :  { %v543_v14 = vpop.f32.mrf.mxu3 }
  0xd9   :  { %v544_v15 = vadd.f32 %v543_v14, %v430_v13 }
  0xdb   :  { %635 = vst [vmem:[#allocation7 + $0x58] sm:$0xff] %v544_v15  ;;  %v207_v18 = vpop.f32.mrf.mxu0 }
  0xdc   :  { %480 = vmatmul.f32.gmra.mxu2 %v88_v16  ;;  %v320_v19 = vpop.f32.mrf.mxu1 }
  0xdd   :  { %593 = vmatmul.f32.gmra.mxu3 %v89_v17  ;;  %v321_v20 = vadd.f32 %v320_v19, %v207_v18 }
  0xde   :  { %254 = vmatmul.f32.gmra.mxu0 %v88_v16  ;;  %v104_v16 = vld [vmem:[#allocation2 + $0x1e0] sm:$0xff] }
  0xdf   :  { %v433_v21 = vpop.f32.mrf.mxu2  ;;  %636 = vst [vmem:[#allocation7 + $0x60] sm:$0xff] %v321_v20  ;;  %367 = vmatmul.f32.gmra.mxu1 %v89_v17  ;;  %v105_v17 = vld [vmem:[#allocation2 + $0x1e8] sm:$0xff] }
  0xe0   :  { %v546_v22 = vpop.f32.mrf.mxu3 }
  0xe1   :  { %v547_v23 = vadd.f32 %v546_v22, %v433_v21 }
  0xe3   :  { %637 = vst [vmem:[#allocation7 + $0x68] sm:$0xff] %v547_v23  ;;  %v210_v26 = vpop.f32.mrf.mxu0 }
  0xe4   :  { %483 = vmatmul.f32.gmra.mxu2 %v90_v24  ;;  %v323_v27 = vpop.f32.mrf.mxu1 }
  0xe5   :  { %596 = vmatmul.f32.gmra.mxu3 %v91_v25  ;;  %v324_v28 = vadd.f32 %v323_v27, %v210_v26 }
  0xe6   :  { %257 = vmatmul.f32.gmra.mxu0 %v90_v24  ;;  %v106_v24 = vld [vmem:[#allocation2 + $0x1f0] sm:$0xff] }
  0xe7   :  { %v436_v29 = vpop.f32.mrf.mxu2  ;;  %638 = vst [vmem:[#allocation7 + $0x70] sm:$0xff] %v324_v28  ;;  %370 = vmatmul.f32.gmra.mxu1 %v91_v25  ;;  %v107_v25 = vld [vmem:[#allocation2 + $0x1f8] sm:$0xff] }
  0xe8   :  { %v549_v30 = vpop.f32.mrf.mxu3 }
  0xe9   :  { %v550_v31 = vadd.f32 %v549_v30, %v436_v29 }
  0xeb   :  { %639 = vst [vmem:[#allocation7 + $0x78] sm:$0xff] %v550_v31  ;;  %v213_v34 = vpop.f32.mrf.mxu0 }
  0xec   :  { %486 = vmatmul.f32.gmra.mxu2 %v92_v32  ;;  %v326_v35 = vpop.f32.mrf.mxu1 }
  0xed   :  { %599 = vmatmul.f32.gmra.mxu3 %v93_v33  ;;  %v327_v36 = vadd.f32 %v326_v35, %v213_v34 }
  0xee   :  { %260 = vmatmul.f32.gmra.mxu0 %v92_v32 }
  0xef   :  { %v439_v37 = vpop.f32.mrf.mxu2  ;;  %640 = vst [vmem:[#allocation7 + $0x80] sm:$0xff] %v327_v36  ;;  %373 = vmatmul.f32.gmra.mxu1 %v93_v33 }
  0xf0   :  { %v552_v38 = vpop.f32.mrf.mxu3 }
  0xf1   :  { %v553_v39 = vadd.f32 %v552_v38, %v439_v37 }
  0xf3   :  { %641 = vst [vmem:[#allocation7 + $0x88] sm:$0xff] %v553_v39  ;;  %v216_v42 = vpop.f32.mrf.mxu0 }
  0xf4   :  { %489 = vmatmul.f32.gmra.mxu2 %v94_v40  ;;  %v329_v43 = vpop.f32.mrf.mxu1 }
  0xf5   :  { %602 = vmatmul.f32.gmra.mxu3 %v95_v41  ;;  %v330_v44 = vadd.f32 %v329_v43, %v216_v42 }
  0xf6   :  { %263 = vmatmul.f32.gmra.mxu0 %v94_v40 }
  0xf7   :  { %v442_v45 = vpop.f32.mrf.mxu2  ;;  %642 = vst [vmem:[#allocation7 + $0x90] sm:$0xff] %v330_v44  ;;  %376 = vmatmul.f32.gmra.mxu1 %v95_v41 }
  0xf8   :  { %v555_v46 = vpop.f32.mrf.mxu3 }
  0xf9   :  { %v556_v47 = vadd.f32 %v555_v46, %v442_v45 }
  0xfb   :  { %643 = vst [vmem:[#allocation7 + $0x98] sm:$0xff] %v556_v47  ;;  %v219_v50 = vpop.f32.mrf.mxu0 }
  0xfc   :  { %492 = vmatmul.f32.gmra.mxu2 %v96_v48  ;;  %v332_v51 = vpop.f32.mrf.mxu1 }
  0xfd   :  { %605 = vmatmul.f32.gmra.mxu3 %v97_v49  ;;  %v333_v52 = vadd.f32 %v332_v51, %v219_v50 }
  0xfe   :  { %266 = vmatmul.f32.gmra.mxu0 %v96_v48 }
  0xff   :  { %v445_v53 = vpop.f32.mrf.mxu2  ;;  %644 = vst [vmem:[#allocation7 + $0xa0] sm:$0xff] %v333_v52  ;;  %379 = vmatmul.f32.gmra.mxu1 %v97_v49 }
 0x100   :  { %v558_v54 = vpop.f32.mrf.mxu3 }
 0x101   :  { %v559_v55 = vadd.f32 %v558_v54, %v445_v53 }
 0x103   :  { %645 = vst [vmem:[#allocation7 + $0xa8] sm:$0xff] %v559_v55  ;;  %v222_v58 = vpop.f32.mrf.mxu0 }
 0x104   :  { %495 = vmatmul.f32.gmra.mxu2 %v98_v56  ;;  %v335_v59 = vpop.f32.mrf.mxu1 }
 0x105   :  { %608 = vmatmul.f32.gmra.mxu3 %v99_v57  ;;  %v336_v60 = vadd.f32 %v335_v59, %v222_v58 }
 0x106   :  { %269 = vmatmul.f32.gmra.mxu0 %v98_v56 }
 0x107   :  { %v448_v61 = vpop.f32.mrf.mxu2  ;;  %646 = vst [vmem:[#allocation7 + $0xb0] sm:$0xff] %v336_v60  ;;  %382 = vmatmul.f32.gmra.mxu1 %v99_v57 }
 0x108   :  { %v561_v62 = vpop.f32.mrf.mxu3 }
 0x109   :  { %v562_v63 = vadd.f32 %v561_v62, %v448_v61 }
 0x10b   :  { %647 = vst [vmem:[#allocation7 + $0xb8] sm:$0xff] %v562_v63  ;;  %v225_v2 = vpop.f32.mrf.mxu0 }
 0x10c   :  { %498 = vmatmul.f32.gmra.mxu2 %v100_v0  ;;  %v338_v3 = vpop.f32.mrf.mxu1 }
 0x10d   :  { %611 = vmatmul.f32.gmra.mxu3 %v101_v1  ;;  %v339_v4 = vadd.f32 %v338_v3, %v225_v2 }
 0x10e   :  { %272 = vmatmul.f32.gmra.mxu0 %v100_v0 }
 0x10f   :  { %v451_v5 = vpop.f32.mrf.mxu2  ;;  %648 = vst [vmem:[#allocation7 + $0xc0] sm:$0xff] %v339_v4  ;;  %385 = vmatmul.f32.gmra.mxu1 %v101_v1 }
 0x110   :  { %v564_v6 = vpop.f32.mrf.mxu3 }
 0x111   :  { %v565_v7 = vadd.f32 %v564_v6, %v451_v5 }
 0x113   :  { %649 = vst [vmem:[#allocation7 + $0xc8] sm:$0xff] %v565_v7  ;;  %v228_v10 = vpop.f32.mrf.mxu0 }
 0x114   :  { %501 = vmatmul.f32.gmra.mxu2 %v102_v8  ;;  %v341_v11 = vpop.f32.mrf.mxu1 }
 0x115   :  { %614 = vmatmul.f32.gmra.mxu3 %v103_v9  ;;  %v342_v12 = vadd.f32 %v341_v11, %v228_v10 }
 0x116   :  { %275 = vmatmul.f32.gmra.mxu0 %v102_v8 }
 0x117   :  { %v454_v13 = vpop.f32.mrf.mxu2  ;;  %650 = vst [vmem:[#allocation7 + $0xd0] sm:$0xff] %v342_v12  ;;  %388 = vmatmul.f32.gmra.mxu1 %v103_v9 }
 0x118   :  { %v567_v14 = vpop.f32.mrf.mxu3 }
 0x119   :  { %v568_v15 = vadd.f32 %v567_v14, %v454_v13 }
 0x11b   :  { %651 = vst [vmem:[#allocation7 + $0xd8] sm:$0xff] %v568_v15  ;;  %v231_v18 = vpop.f32.mrf.mxu0 }
 0x11c   :  { %504 = vmatmul.f32.gmra.mxu2 %v104_v16  ;;  %v344_v19 = vpop.f32.mrf.mxu1 }
 0x11d   :  { %617 = vmatmul.f32.gmra.mxu3 %v105_v17  ;;  %v345_v20 = vadd.f32 %v344_v19, %v231_v18 }
 0x11e   :  { %278 = vmatmul.f32.gmra.mxu0 %v104_v16 }
 0x11f   :  { %v457_v21 = vpop.f32.mrf.mxu2  ;;  %652 = vst [vmem:[#allocation7 + $0xe0] sm:$0xff] %v345_v20  ;;  %391 = vmatmul.f32.gmra.mxu1 %v105_v17 }
 0x120   :  { %v570_v22 = vpop.f32.mrf.mxu3 }
 0x121   :  { %v571_v23 = vadd.f32 %v570_v22, %v457_v21 }
 0x123   :  { %653 = vst [vmem:[#allocation7 + $0xe8] sm:$0xff] %v571_v23  ;;  %v234_v26 = vpop.f32.mrf.mxu0 }
 0x124   :  { %507 = vmatmul.f32.gmra.mxu2 %v106_v24  ;;  %v347_v27 = vpop.f32.mrf.mxu1 }
 0x125   :  { %620 = vmatmul.f32.gmra.mxu3 %v107_v25  ;;  %v348_v28 = vadd.f32 %v347_v27, %v234_v26 }
 0x126   :  { %281 = vmatmul.f32.gmra.mxu0 %v106_v24 }
 0x127   :  { %v460_v29 = vpop.f32.mrf.mxu2  ;;  %654 = vst [vmem:[#allocation7 + $0xf0] sm:$0xff] %v348_v28  ;;  %394 = vmatmul.f32.gmra.mxu1 %v107_v25 }
 0x128   :  { %v573_v30 = vpop.f32.mrf.mxu3 }
 0x129   :  { %v574_v31 = vadd.f32 %v573_v30, %v460_v29 }
 0x12b   :  { %655 = vst [vmem:[#allocation7 + $0xf8] sm:$0xff] %v574_v31  ;;  %v237_v32 = vpop.f32.mrf.mxu0 }
 0x12c   :  { %v350_v33 = vpop.f32.mrf.mxu1 }
 0x12d   :  { %v351_v34 = vadd.f32 %v350_v33, %v237_v32 }
 0x12f   :  { %v463_v35 = vpop.f32.mrf.mxu2  ;;  %656 = vst [vmem:[#allocation7 + $0x100] sm:$0xff] %v351_v34 }
 0x130   :  { %v576_v36 = vpop.f32.mrf.mxu3 }
 0x131   :  { %v577_v37 = vadd.f32 %v576_v36, %v463_v35 }
 0x133   :  { %657 = vst [vmem:[#allocation7 + $0x108] sm:$0xff] %v577_v37  ;;  %v240_v38 = vpop.f32.mrf.mxu0 }
 0x134   :  { %v353_v39 = vpop.f32.mrf.mxu1 }
 0x135   :  { %v354_v40 = vadd.f32 %v353_v39, %v240_v38 }
 0x137   :  { %v466_v41 = vpop.f32.mrf.mxu2  ;;  %658 = vst [vmem:[#allocation7 + $0x110] sm:$0xff] %v354_v40 }
 0x138   :  { %v579_v42 = vpop.f32.mrf.mxu3 }
 0x139   :  { %v580_v43 = vadd.f32 %v579_v42, %v466_v41 }
 0x13b   :  { %659 = vst [vmem:[#allocation7 + $0x118] sm:$0xff] %v580_v43  ;;  %v243_v44 = vpop.f32.mrf.mxu0 }
 0x13c   :  { %v356_v45 = vpop.f32.mrf.mxu1 }
 0x13d   :  { %v357_v46 = vadd.f32 %v356_v45, %v243_v44 }
 0x13f   :  { %v469_v47 = vpop.f32.mrf.mxu2  ;;  %660 = vst [vmem:[#allocation7 + $0x120] sm:$0xff] %v357_v46 }
 0x140   :  { %v582_v48 = vpop.f32.mrf.mxu3 }
 0x141   :  { %v583_v49 = vadd.f32 %v582_v48, %v469_v47 }
 0x143   :  { %661 = vst [vmem:[#allocation7 + $0x128] sm:$0xff] %v583_v49  ;;  %v246_v50 = vpop.f32.mrf.mxu0 }
 0x144   :  { %v359_v51 = vpop.f32.mrf.mxu1 }
 0x145   :  { %v360_v52 = vadd.f32 %v359_v51, %v246_v50 }
 0x147   :  { %v472_v53 = vpop.f32.mrf.mxu2  ;;  %662 = vst [vmem:[#allocation7 + $0x130] sm:$0xff] %v360_v52 }
 0x148   :  { %v585_v54 = vpop.f32.mrf.mxu3 }
 0x149   :  { %v586_v55 = vadd.f32 %v585_v54, %v472_v53 }
 0x14b   :  { %663 = vst [vmem:[#allocation7 + $0x138] sm:$0xff] %v586_v55  ;;  %v249_v56 = vpop.f32.mrf.mxu0 }
 0x14c   :  { %v362_v57 = vpop.f32.mrf.mxu1 }
 0x14d   :  { %v363_v58 = vadd.f32 %v362_v57, %v249_v56 }
 0x14f   :  { %v475_v59 = vpop.f32.mrf.mxu2  ;;  %664 = vst [vmem:[#allocation7 + $0x140] sm:$0xff] %v363_v58 }
 0x150   :  { %v588_v60 = vpop.f32.mrf.mxu3 }
 0x151   :  { %v589_v61 = vadd.f32 %v588_v60, %v475_v59 }
 0x153   :  { %665 = vst [vmem:[#allocation7 + $0x148] sm:$0xff] %v589_v61  ;;  %v252_v62 = vpop.f32.mrf.mxu0 }
 0x154   :  { %v365_v63 = vpop.f32.mrf.mxu1 }
 0x155   :  { %v366_v0 = vadd.f32 %v365_v63, %v252_v62 }
 0x157   :  { %v478_v1 = vpop.f32.mrf.mxu2  ;;  %666 = vst [vmem:[#allocation7 + $0x150] sm:$0xff] %v366_v0 }
 0x158   :  { %v591_v2 = vpop.f32.mrf.mxu3 }
 0x159   :  { %v592_v3 = vadd.f32 %v591_v2, %v478_v1 }
 0x15b   :  { %667 = vst [vmem:[#allocation7 + $0x158] sm:$0xff] %v592_v3  ;;  %v255_v4 = vpop.f32.mrf.mxu0 }
 0x15c   :  { %v368_v5 = vpop.f32.mrf.mxu1 }
 0x15d   :  { %v369_v6 = vadd.f32 %v368_v5, %v255_v4 }
 0x15f   :  { %v481_v7 = vpop.f32.mrf.mxu2  ;;  %668 = vst [vmem:[#allocation7 + $0x160] sm:$0xff] %v369_v6 }
 0x160   :  { %v594_v8 = vpop.f32.mrf.mxu3 }
 0x161   :  { %v595_v9 = vadd.f32 %v594_v8, %v481_v7 }
 0x163   :  { %669 = vst [vmem:[#allocation7 + $0x168] sm:$0xff] %v595_v9  ;;  %v258_v10 = vpop.f32.mrf.mxu0 }
 0x164   :  { %v371_v11 = vpop.f32.mrf.mxu1 }
 0x165   :  { %v372_v12 = vadd.f32 %v371_v11, %v258_v10 }
 0x167   :  { %v484_v13 = vpop.f32.mrf.mxu2  ;;  %670 = vst [vmem:[#allocation7 + $0x170] sm:$0xff] %v372_v12 }
 0x168   :  { %v597_v14 = vpop.f32.mrf.mxu3 }
 0x169   :  { %v598_v15 = vadd.f32 %v597_v14, %v484_v13 }
 0x16b   :  { %671 = vst [vmem:[#allocation7 + $0x178] sm:$0xff] %v598_v15  ;;  %v261_v16 = vpop.f32.mrf.mxu0 }
 0x16c   :  { %v374_v17 = vpop.f32.mrf.mxu1 }
 0x16d   :  { %v375_v18 = vadd.f32 %v374_v17, %v261_v16 }
 0x16f   :  { %v487_v19 = vpop.f32.mrf.mxu2  ;;  %672 = vst [vmem:[#allocation7 + $0x180] sm:$0xff] %v375_v18 }
 0x170   :  { %v600_v20 = vpop.f32.mrf.mxu3 }
 0x171   :  { %v601_v21 = vadd.f32 %v600_v20, %v487_v19 }
 0x173   :  { %673 = vst [vmem:[#allocation7 + $0x188] sm:$0xff] %v601_v21  ;;  %v264_v22 = vpop.f32.mrf.mxu0 }
 0x174   :  { %v377_v23 = vpop.f32.mrf.mxu1 }
 0x175   :  { %v378_v24 = vadd.f32 %v377_v23, %v264_v22 }
 0x177   :  { %v490_v25 = vpop.f32.mrf.mxu2  ;;  %674 = vst [vmem:[#allocation7 + $0x190] sm:$0xff] %v378_v24 }
 0x178   :  { %v603_v26 = vpop.f32.mrf.mxu3 }
 0x179   :  { %v604_v27 = vadd.f32 %v603_v26, %v490_v25 }
 0x17b   :  { %675 = vst [vmem:[#allocation7 + $0x198] sm:$0xff] %v604_v27  ;;  %v267_v28 = vpop.f32.mrf.mxu0 }
 0x17c   :  { %v380_v29 = vpop.f32.mrf.mxu1 }
 0x17d   :  { %v381_v30 = vadd.f32 %v380_v29, %v267_v28 }
 0x17f   :  { %v493_v31 = vpop.f32.mrf.mxu2  ;;  %676 = vst [vmem:[#allocation7 + $0x1a0] sm:$0xff] %v381_v30 }
 0x180   :  { %v606_v32 = vpop.f32.mrf.mxu3 }
 0x181   :  { %v607_v33 = vadd.f32 %v606_v32, %v493_v31 }
 0x183   :  { %677 = vst [vmem:[#allocation7 + $0x1a8] sm:$0xff] %v607_v33  ;;  %v270_v34 = vpop.f32.mrf.mxu0 }
 0x184   :  { %v383_v35 = vpop.f32.mrf.mxu1 }
 0x185   :  { %v384_v36 = vadd.f32 %v383_v35, %v270_v34 }
 0x187   :  { %v496_v37 = vpop.f32.mrf.mxu2  ;;  %678 = vst [vmem:[#allocation7 + $0x1b0] sm:$0xff] %v384_v36 }
 0x188   :  { %v609_v38 = vpop.f32.mrf.mxu3 }
 0x189   :  { %v610_v39 = vadd.f32 %v609_v38, %v496_v37 }
 0x18b   :  { %679 = vst [vmem:[#allocation7 + $0x1b8] sm:$0xff] %v610_v39  ;;  %v273_v40 = vpop.f32.mrf.mxu0 }
 0x18c   :  { %v386_v41 = vpop.f32.mrf.mxu1 }
 0x18d   :  { %v387_v42 = vadd.f32 %v386_v41, %v273_v40 }
 0x18f   :  { %v499_v43 = vpop.f32.mrf.mxu2  ;;  %680 = vst [vmem:[#allocation7 + $0x1c0] sm:$0xff] %v387_v42 }
 0x190   :  { %v612_v44 = vpop.f32.mrf.mxu3 }
 0x191   :  { %v613_v45 = vadd.f32 %v612_v44, %v499_v43 }
 0x193   :  { %681 = vst [vmem:[#allocation7 + $0x1c8] sm:$0xff] %v613_v45  ;;  %v276_v46 = vpop.f32.mrf.mxu0 }
 0x194   :  { %v389_v47 = vpop.f32.mrf.mxu1 }
 0x195   :  { %v390_v48 = vadd.f32 %v389_v47, %v276_v46 }
 0x197   :  { %v502_v49 = vpop.f32.mrf.mxu2  ;;  %682 = vst [vmem:[#allocation7 + $0x1d0] sm:$0xff] %v390_v48 }
 0x198   :  { %v615_v50 = vpop.f32.mrf.mxu3 }
 0x199   :  { %v616_v51 = vadd.f32 %v615_v50, %v502_v49 }
 0x19b   :  { %683 = vst [vmem:[#allocation7 + $0x1d8] sm:$0xff] %v616_v51  ;;  %v279_v52 = vpop.f32.mrf.mxu0 }
 0x19c   :  { %v392_v53 = vpop.f32.mrf.mxu1 }
 0x19d   :  { %v393_v54 = vadd.f32 %v392_v53, %v279_v52 }
 0x19f   :  { %v505_v55 = vpop.f32.mrf.mxu2  ;;  %684 = vst [vmem:[#allocation7 + $0x1e0] sm:$0xff] %v393_v54 }
 0x1a0   :  { %v618_v56 = vpop.f32.mrf.mxu3 }
 0x1a1   :  { %v619_v57 = vadd.f32 %v618_v56, %v505_v55 }
 0x1a3   :  { %685 = vst [vmem:[#allocation7 + $0x1e8] sm:$0xff] %v619_v57  ;;  %v282_v58 = vpop.f32.mrf.mxu0 }
 0x1a4   :  { %v395_v59 = vpop.f32.mrf.mxu1 }
 0x1a5   :  { %v396_v60 = vadd.f32 %v395_v59, %v282_v58 }
 0x1a7   :  { %v508_v61 = vpop.f32.mrf.mxu2  ;;  %686 = vst [vmem:[#allocation7 + $0x1f0] sm:$0xff] %v396_v60 }
 0x1a8   :  { %v621_v62 = vpop.f32.mrf.mxu3 }
 0x1a9   :  { %v622_v63 = vadd.f32 %v621_v62, %v508_v61 }
 0x1ab   :  { %687 = vst [vmem:[#allocation7 + $0x1f8] sm:$0xff] %v622_v63 }
 0x1ac   :  { %700 = dma.vmem_to_hbm [thread:$0]  %s693_s1, 8192, %s695_s23, [#allocation4], %s792_s17, %s792_s17, %s793_s18  }
 0x1ad   :  { %789 = dma.done.wait [#allocation4], 8192  }
 0x1ae   :  { %790 = vsyncadd [#allocation4], 4294959104 }
 0x1af   :  { %705 = vsyncpa [#allocation3], 1 }
 0x1b0   :  { %706 = vsyncpa [#allocation6], 1 }
 0x1b1   :  { %707 = vsyncpa [#allocation4], 1 }

</bundles_post_ra>
